<compile_context>
chip_gen: v6e
topology: v6e:2x2x1
jax: 0.10.0
libtpu: 0.0.40
codegen_flags: <defaults>
</compile_context>

<pallas_src>
import functools

import jax
import jax.numpy as jnp
from jax.experimental import pallas as pl
from jax.experimental.pallas import tpu as pltpu


def _sepconv_kernel(x_ref, w_ref, b_ref, o_ref, *, K, W):
    """Fused separable conv as one lane-dense MXU matmul.

    x_ref: (C, B*H*W)      channels on sublanes, flat (b, h, w) on lanes
    w_ref: (Cout, K*K*C)   fused weight  w_eff[o, t*C + c]
    b_ref: (Cout, 1)       fused bias
    o_ref: (Cout, B*H*W)   full-width output (wrapper slices the valid region)
    """
    x = x_ref[...].astype(jnp.float32)          # (C, BHW)
    n = x.shape[-1]

    # Im2col via XLU lane rotations: window shift (kh, kw) == flat left-roll
    # by d = kh*W + kw.  Wrap-around garbage only reaches positions that are
    # outside the valid Ho x Wo region (discarded by the wrapper).
    cols = []
    for kh in range(K):
        for kw in range(K):
            d = kh * W + kw
            cols.append(x if d == 0 else pltpu.roll(x, shift=n - d, axis=1))
    patches = jnp.concatenate(cols, axis=0)     # (K*K*C, BHW)

    w = w_ref[...].astype(jnp.float32)          # (Cout, K*K*C)
    out = jnp.dot(w, patches, preferred_element_type=jnp.float32)  # (Cout, BHW)
    out = out + b_ref[...].astype(jnp.float32)  # lane-dense bias add
    o_ref[...] = out.astype(o_ref.dtype)


def separable_conv(x, w_dw, b_dw, w_pw, b_pw):
    """Matches torch SeparableConv.forward: depthwise (valid) then 1x1 conv."""
    B, C, H, W = x.shape
    K = w_dw.shape[-1]
    Cout = w_pw.shape[0]
    Ho, Wo = H - K + 1, W - K + 1
    BHW = B * H * W

    # --- parameter folding (tiny wrapper-side glue) --------------------------
    w_dw_f = w_dw.reshape(C, K * K)                       # (C, KK)
    w_pw_m = w_pw.reshape(Cout, C)                        # (Cout, C)
    # w_eff[o, t*C + c] = w_pw[o, c] * w_dw[c, t]
    w_eff = (w_pw_m[:, None, :] * w_dw_f.T[None, :, :]).reshape(Cout, K * K * C)
    b_eff = (w_pw_m @ b_dw + b_pw).reshape(Cout, 1)

    # --- layout plumbing: channels -> sublanes, flat (b,h,w) -> lanes --------
    x_k = x.transpose(1, 0, 2, 3).reshape(C, BHW)

    kernel = functools.partial(_sepconv_kernel, K=K, W=W)

    flops = 2 * Cout * (K * K * C) * BHW
    bytes_accessed = 4 * (C * BHW + Cout * K * K * C + Cout + Cout * BHW)

    out_flat = pl.pallas_call(
        kernel,
        out_shape=jax.ShapeDtypeStruct((Cout, BHW), x.dtype),
        grid_spec=pltpu.PrefetchScalarGridSpec(
            num_scalar_prefetch=0,
            grid=(1,),  # whole (tiny) batch in one step; amortizes step overhead
            in_specs=[
                pl.BlockSpec((C, BHW), lambda i: (0, 0)),
                pl.BlockSpec((Cout, K * K * C), lambda i: (0, 0)),
                pl.BlockSpec((Cout, 1), lambda i: (0, 0)),
            ],
            out_specs=pl.BlockSpec((Cout, BHW), lambda i: (0, 0)),
        ),
        compiler_params=pltpu.CompilerParams(
            dimension_semantics=("arbitrary",)),
        cost_estimate=pl.CostEstimate(
            flops=flops, transcendentals=0, bytes_accessed=bytes_accessed),
    )(x_k, w_eff, b_eff)

    # Full-width conv result; the valid region is the leading Ho x Wo block.
    out = out_flat.reshape(Cout, B, H, W).transpose(1, 0, 2, 3)[:, :, :Ho, :Wo]
    return out


def reference_sepconv(x, w_dw, b_dw, w_pw, b_pw):
    """Pure-JAX reference using lax.conv_general_dilated (NCHW, like PyTorch)."""
    C = x.shape[1]
    dw = jax.lax.conv_general_dilated(
        x, w_dw, window_strides=(1, 1), padding="VALID",
        dimension_numbers=("NCHW", "OIHW", "NCHW"),
        feature_group_count=C,
        precision=jax.lax.Precision.HIGHEST,
    ) + b_dw[None, :, None, None]
    pw = jax.lax.conv_general_dilated(
        dw, w_pw, window_strides=(1, 1), padding="VALID",
        dimension_numbers=("NCHW", "OIHW", "NCHW"),
        precision=jax.lax.Precision.HIGHEST,
    ) + b_pw[None, :, None, None]
    return pw


if __name__ == "__main__":
    # SeparableConv(nin=4, nout=8, kernel_size=5) on a 16x16 image, batch 2.
    B, nin, nout, K, H, W = 2, 4, 8, 5, 16, 16

    key = jax.random.PRNGKey(0)
    kx, kw1, kb1, kw2, kb2 = jax.random.split(key, 5)

    x = jax.random.normal(kx, (B, nin, H, W), dtype=jnp.float32)
    w_dw = jax.random.normal(kw1, (nin, 1, K, K), dtype=jnp.float32) * 0.1
    b_dw = jax.random.normal(kb1, (nin,), dtype=jnp.float32) * 0.1
    w_pw = jax.random.normal(kw2, (nout, nin, 1, 1), dtype=jnp.float32) * 0.1
    b_pw = jax.random.normal(kb2, (nout,), dtype=jnp.float32) * 0.1

    out = jax.block_until_ready(separable_conv(x, w_dw, b_dw, w_pw, b_pw))
    ref = reference_sepconv(x, w_dw, b_dw, w_pw, b_pw)

    assert out.shape == (B, nout, H - K + 1, W - K + 1), out.shape
    # Tolerance covers MXU f32 (bf16-pass) matmul precision vs the XLA reference.
    assert jnp.allclose(out, ref, atol=1e-3, rtol=1e-3), "mismatch vs reference"

    print("KERNEL_OK")
</pallas_src>

<mosaic_0001>
module attributes {stable_mosaic.version = 11 : i64} {
  func.func @_sepconv_kernel(%arg0: i32, %arg1: memref<4x512xf32, #tpu.memory_space<vmem>>, %arg2: memref<8x100xf32, #tpu.memory_space<vmem>>, %arg3: memref<8x1xf32, #tpu.memory_space<vmem>>, %arg4: memref<8x512xf32, #tpu.memory_space<vmem>>) attributes {dimension_semantics = [#tpu.dimension_semantics<arbitrary>], iteration_bounds = array<i64: 1>, scalar_prefetch = 0 : i64, scratch_operands = 0 : i64, tpu.core_type = #tpu.core_type<tc>, window_params = [{pipeline_mode = #tpu.pipeline_mode<synchronous>, transform_indices = @transform_0, window_bounds = array<i64: 4, 512>}, {pipeline_mode = #tpu.pipeline_mode<synchronous>, transform_indices = @transform_1, window_bounds = array<i64: 8, 100>}, {pipeline_mode = #tpu.pipeline_mode<synchronous>, transform_indices = @transform_2, window_bounds = array<i64: 8, 1>}, {pipeline_mode = #tpu.pipeline_mode<synchronous>, transform_indices = @transform_3, window_bounds = array<i64: 8, 512>}]} {
    %c0 = arith.constant 0 : index
    %c0_0 = arith.constant 0 : index
    %0 = vector.load %arg1[%c0, %c0_0] : memref<4x512xf32, #tpu.memory_space<vmem>>, vector<4x512xf32>
    %c511_i32 = arith.constant 511 : i32
    %1 = tpu.dynamic_rotate %0 by %c511_i32 dim 1 : vector<4x512xf32>, i32 -> vector<4x512xf32>
    %c510_i32 = arith.constant 510 : i32
    %2 = tpu.dynamic_rotate %0 by %c510_i32 dim 1 : vector<4x512xf32>, i32 -> vector<4x512xf32>
    %c509_i32 = arith.constant 509 : i32
    %3 = tpu.dynamic_rotate %0 by %c509_i32 dim 1 : vector<4x512xf32>, i32 -> vector<4x512xf32>
    %c508_i32 = arith.constant 508 : i32
    %4 = tpu.dynamic_rotate %0 by %c508_i32 dim 1 : vector<4x512xf32>, i32 -> vector<4x512xf32>
    %c496_i32 = arith.constant 496 : i32
    %5 = tpu.dynamic_rotate %0 by %c496_i32 dim 1 : vector<4x512xf32>, i32 -> vector<4x512xf32>
    %c495_i32 = arith.constant 495 : i32
    %6 = tpu.dynamic_rotate %0 by %c495_i32 dim 1 : vector<4x512xf32>, i32 -> vector<4x512xf32>
    %c494_i32 = arith.constant 494 : i32
    %7 = tpu.dynamic_rotate %0 by %c494_i32 dim 1 : vector<4x512xf32>, i32 -> vector<4x512xf32>
    %c493_i32 = arith.constant 493 : i32
    %8 = tpu.dynamic_rotate %0 by %c493_i32 dim 1 : vector<4x512xf32>, i32 -> vector<4x512xf32>
    %c492_i32 = arith.constant 492 : i32
    %9 = tpu.dynamic_rotate %0 by %c492_i32 dim 1 : vector<4x512xf32>, i32 -> vector<4x512xf32>
    %c480_i32 = arith.constant 480 : i32
    %10 = tpu.dynamic_rotate %0 by %c480_i32 dim 1 : vector<4x512xf32>, i32 -> vector<4x512xf32>
    %c479_i32 = arith.constant 479 : i32
    %11 = tpu.dynamic_rotate %0 by %c479_i32 dim 1 : vector<4x512xf32>, i32 -> vector<4x512xf32>
    %c478_i32 = arith.constant 478 : i32
    %12 = tpu.dynamic_rotate %0 by %c478_i32 dim 1 : vector<4x512xf32>, i32 -> vector<4x512xf32>
    %c477_i32 = arith.constant 477 : i32
    %13 = tpu.dynamic_rotate %0 by %c477_i32 dim 1 : vector<4x512xf32>, i32 -> vector<4x512xf32>
    %c476_i32 = arith.constant 476 : i32
    %14 = tpu.dynamic_rotate %0 by %c476_i32 dim 1 : vector<4x512xf32>, i32 -> vector<4x512xf32>
    %c464_i32 = arith.constant 464 : i32
    %15 = tpu.dynamic_rotate %0 by %c464_i32 dim 1 : vector<4x512xf32>, i32 -> vector<4x512xf32>
    %c463_i32 = arith.constant 463 : i32
    %16 = tpu.dynamic_rotate %0 by %c463_i32 dim 1 : vector<4x512xf32>, i32 -> vector<4x512xf32>
    %c462_i32 = arith.constant 462 : i32
    %17 = tpu.dynamic_rotate %0 by %c462_i32 dim 1 : vector<4x512xf32>, i32 -> vector<4x512xf32>
    %c461_i32 = arith.constant 461 : i32
    %18 = tpu.dynamic_rotate %0 by %c461_i32 dim 1 : vector<4x512xf32>, i32 -> vector<4x512xf32>
    %c460_i32 = arith.constant 460 : i32
    %19 = tpu.dynamic_rotate %0 by %c460_i32 dim 1 : vector<4x512xf32>, i32 -> vector<4x512xf32>
    %c448_i32 = arith.constant 448 : i32
    %20 = tpu.dynamic_rotate %0 by %c448_i32 dim 1 : vector<4x512xf32>, i32 -> vector<4x512xf32>
    %c447_i32 = arith.constant 447 : i32
    %21 = tpu.dynamic_rotate %0 by %c447_i32 dim 1 : vector<4x512xf32>, i32 -> vector<4x512xf32>
    %c446_i32 = arith.constant 446 : i32
    %22 = tpu.dynamic_rotate %0 by %c446_i32 dim 1 : vector<4x512xf32>, i32 -> vector<4x512xf32>
    %c445_i32 = arith.constant 445 : i32
    %23 = tpu.dynamic_rotate %0 by %c445_i32 dim 1 : vector<4x512xf32>, i32 -> vector<4x512xf32>
    %c444_i32 = arith.constant 444 : i32
    %24 = tpu.dynamic_rotate %0 by %c444_i32 dim 1 : vector<4x512xf32>, i32 -> vector<4x512xf32>
    %25 = tpu.concatenate %0, %1, %2, %3, %4, %5, %6, %7, %8, %9, %10, %11, %12, %13, %14, %15 in 0 : vector<4x512xf32>, vector<4x512xf32>, vector<4x512xf32>, vector<4x512xf32>, vector<4x512xf32>, vector<4x512xf32>, vector<4x512xf32>, vector<4x512xf32>, vector<4x512xf32>, vector<4x512xf32>, vector<4x512xf32>, vector<4x512xf32>, vector<4x512xf32>, vector<4x512xf32>, vector<4x512xf32>, vector<4x512xf32> -> vector<64x512xf32>
    %26 = tpu.concatenate %16, %17, %18, %19, %20, %21, %22, %23, %24 in 0 : vector<4x512xf32>, vector<4x512xf32>, vector<4x512xf32>, vector<4x512xf32>, vector<4x512xf32>, vector<4x512xf32>, vector<4x512xf32>, vector<4x512xf32>, vector<4x512xf32> -> vector<36x512xf32>
    %27 = tpu.concatenate %25, %26 in 0 : vector<64x512xf32>, vector<36x512xf32> -> vector<100x512xf32>
    %c0_1 = arith.constant 0 : index
    %c0_2 = arith.constant 0 : index
    %28 = vector.load %arg2[%c0_1, %c0_2] : memref<8x100xf32, #tpu.memory_space<vmem>>, vector<8x100xf32>
    %cst = arith.constant dense<0.000000e+00> : vector<8x512xf32>
    %29 = tpu.matmul %28, %27, %cst {dimension_numbers = #tpu.dot_dimension_numbers<[1], [0], [0], [1], [0, 0, 1, 1], [], []>} : vector<8x100xf32>, vector<100x512xf32>, vector<8x512xf32> -> vector<8x512xf32>
    %c0_3 = arith.constant 0 : index
    %c0_4 = arith.constant 0 : index
    %30 = vector.load %arg3[%c0_3, %c0_4] : memref<8x1xf32, #tpu.memory_space<vmem>>, vector<8x1xf32>
    %31 = vector.broadcast %30 : vector<8x1xf32> to vector<8x512xf32>
    %32 = arith.addf %29, %31 : vector<8x512xf32>
    %c0_5 = arith.constant 0 : index
    %c0_6 = arith.constant 0 : index
    %33 = vector.load %arg4[%c0_5, %c0_6] : memref<8x512xf32, #tpu.memory_space<vmem>>, vector<8x512xf32>
    tpu.vector_store %arg4[%c0_5, %c0_6], %32 {strides = array<i32>} : memref<8x512xf32, #tpu.memory_space<vmem>>, vector<8x512xf32>,
    return
  }
  func.func @transform_0(%arg0: i32) -> (i32, i32) {
    %c0_i32 = arith.constant 0 : i32
    %c0_i32_0 = arith.constant 0 : i32
    %c0_i32_1 = arith.constant 0 : i32
    return %c0_i32, %c0_i32_0 : i32, i32
  }
  func.func @transform_1(%arg0: i32) -> (i32, i32) {
    %c0_i32 = arith.constant 0 : i32
    %c0_i32_0 = arith.constant 0 : i32
    %c0_i32_1 = arith.constant 0 : i32
    return %c0_i32, %c0_i32_0 : i32, i32
  }
  func.func @transform_2(%arg0: i32) -> (i32, i32) {
    %c0_i32 = arith.constant 0 : i32
    %c0_i32_0 = arith.constant 0 : i32
    %c0_i32_1 = arith.constant 0 : i32
    return %c0_i32, %c0_i32_0 : i32, i32
  }
  func.func @transform_3(%arg0: i32) -> (i32, i32) {
    %c0_i32 = arith.constant 0 : i32
    %c0_i32_0 = arith.constant 0 : i32
    %c0_i32_1 = arith.constant 0 : i32
    return %c0_i32, %c0_i32_0 : i32, i32
  }
}

</mosaic_0001>

<bundles_post_ra>
// kernel: tpu_custom_call.1
= control target key start
LH: loop header
LB: loop body
LE: loop exit
PB: predicated region body
PF: predicated region fallthrough
CT: control target
= control target key end

     0   :  { %8 = vsyncpa [#allocation3], 0  ;;  %s1061_s0 = inlined_call_operand.hbm [shape: f32[4,512], index: 0, kind: input, shape index: {}]   ;;  %s1062_s1 = inlined_call_operand.vmem [shape: f32[8,100], index: 1, kind: input, shape index: {}]   ;;  %s1063_s2 = inlined_call_operand.vmem [shape: f32[8,1], index: 2, kind: input, shape index: {}]   ;;  %s1064_s3 = inlined_call_operand.hbm [shape: f32[8,512], index: 3, kind: output, shape index: {}]  }
   0x1   :  { %9 = vsyncpa [#allocation4], 0  ;;  %s807_s12 = smov [#allocation2]  }
   0x2   :  { %s16_s13 = sshll.u32 %s807_s12, 4  ;;  %s17_s13 = int_to_ptr.vmem [resolvable:$true] %s16_s13 }
   0x3   :  { %s771_s14 = scalar_lea.vmem %s17_s13, 256  ;;  %p776_p1 = scmp.lt.s32.totalorder %s17_s13, %s17_s13 }
   0x4   :  { %p772_p0 = scmp.ne.s32.totalorder %s17_s13, %s771_s14  ;;  %p777_p2 = scmp.lt.s32.totalorder %s771_s14, %s771_s14 }
   0x6   :  { %p778_p3 = por %p777_p2, %p776_p1 }
   0x8   :  { %p779_p4 = pnand %p778_p3, %p772_p0 }
   0xa   :  { %782 = shalt.err (!%p779_p4)
}
   0xb   :  { %19 = dma.hbm_to_vmem [thread:$0]  %s1061_s0, 256, %s17_s13, [#allocation3]  }
   0xc   :  { %803 = dma.done.wait [#allocation3], 256  }
   0xd   :  { %804 = vsyncadd [#allocation3], 4294967040  ;;  %v858_v0 = vld [vmem:[#allocation2] sm:$0xff]  ;;  %v860_v1 = vld [vmem:[#allocation2 + $0x8] sm:$0xff]  ;;  %s808_s17 = smov 61   ;;  %s809_s0 = smov 60   ;;  %v43_v8 = vlaneseq }
   0xe   :  { %v864_v2 = vcombine.high %v860_v1, %v860_v1  ;;  %327 = vrot.lane.b32.xlu1 %v860_v1, %s808_s17  ;;  %323 = vrot.lane.b32.xlu0 %v858_v0, %s808_s17  ;;  %v870_v3 = vcombine.high %v858_v0, %v858_v0  ;;  %s810_s18 = smov 63   ;;  %s811_s19 = smov 62   ;;  %vm445_vm0 = vcmask 1043456  }
   0xf   :  { %s812_s20 = smov 76   ;;  %s813_s21 = smov 64   ;;  %v932_v11 = vand.u32 127, %v43_v8 }
  0x10   :  { %s814_s22 = smov 78   ;;  %s815_s23 = smov 77  }
  0x11   :  { %s816_s24 = smov 80   ;;  %s817_s25 = smov 79   ;;  %vm344_vm1 = vcmp.lt.s32.totalorder %v932_v11, 60  ;;  %vm331_vm2 = vcmp.lt.s32.totalorder %v932_v11, 61  ;;  %vm318_vm3 = vcmp.lt.s32.totalorder %v932_v11, 62  ;;  %vm305_vm4 = vcmp.lt.s32.totalorder %v932_v11, 63 }
  0x12   :  { %329 = vrot.lane.b32.xlu1 %v864_v2, %s808_s17  ;;  %336 = vrot.lane.b32.xlu0 %v858_v0, %s809_s0  ;;  %s818_s26 = smov 93   ;;  %s819_s27 = smov 92   ;;  %vm292_vm5 = vcmp.lt.s32.totalorder %v932_v11, 64  ;;  %vm279_vm6 = vcmp.lt.s32.totalorder %v932_v11, 76  ;;  %vm266_vm7 = vcmp.lt.s32.totalorder %v932_v11, 77  ;;  %vm253_vm8 = vcmp.lt.s32.totalorder %v932_v11, 78 }
  0x13   :  { %s820_s28 = smov 95   ;;  %s821_s29 = smov 94   ;;  %vm240_vm9 = vcmp.lt.s32.totalorder %v932_v11, 79  ;;  %vm227_vm10 = vcmp.lt.s32.totalorder %v932_v11, 80  ;;  %vm214_vm11 = vcmp.lt.s32.totalorder %v932_v11, 92  ;;  %vm201_vm12 = vcmp.lt.s32.totalorder %v932_v11, 93 }
  0x14   :  { %s822_s30 = smov 108   ;;  %s823_s4 = smov 96   ;;  %vm188_vm13 = vcmp.lt.s32.totalorder %v932_v11, 94  ;;  %vm175_vm14 = vcmp.lt.s32.totalorder %v932_v11, 95  ;;  %vm162_vm15 = vcmp.lt.s32.totalorder %v932_v11, 96 }
  0x15   :  { %s824_s5 = smov 110   ;;  %s825_s6 = smov 109  }
  0x16   :  { %338 = vrot.lane.b32.xlu1 %v870_v3, %s809_s0  ;;  %325 = vrot.lane.b32.xlu0 %v870_v3, %s808_s17  ;;  %s826_s7 = smov 112   ;;  %s827_s8 = smov 111  }
  0x17   :  { %s828_s9 = smov 125   ;;  %s829_s10 = smov 124  }
  0x18   :  { %s830_s11 = smov 127   ;;  %s833_s12 = smov 126  }
  0x1a   :  { %342 = vrot.lane.b32.xlu1 %v864_v2, %s809_s0  ;;  %340 = vrot.lane.b32.xlu0 %v860_v1, %s809_s0 }
  0x1e   :  { %299 = vrot.lane.b32.xlu1 %v870_v3, %s810_s18  ;;  %297 = vrot.lane.b32.xlu0 %v858_v0, %s810_s18 }
  0x22   :  { %303 = vrot.lane.b32.xlu1 %v864_v2, %s810_s18  ;;  %301 = vrot.lane.b32.xlu0 %v860_v1, %s810_s18 }
  0x26   :  { %312 = vrot.lane.b32.xlu1 %v870_v3, %s811_s19  ;;  %310 = vrot.lane.b32.xlu0 %v858_v0, %s811_s19 }
  0x2a   :  { %316 = vrot.lane.b32.xlu1 %v864_v2, %s811_s19  ;;  %314 = vrot.lane.b32.xlu0 %v860_v1, %s811_s19 }
  0x2e   :  { %273 = vrot.lane.b32.xlu1 %v870_v3, %s812_s20  ;;  %271 = vrot.lane.b32.xlu0 %v858_v0, %s812_s20 }
  0x32   :  { %277 = vrot.lane.b32.xlu1 %v864_v2, %s812_s20  ;;  %275 = vrot.lane.b32.xlu0 %v860_v1, %s812_s20 }
  0x36   :  { %286 = vrot.lane.b32.xlu1 %v870_v3, %s813_s21  ;;  %284 = vrot.lane.b32.xlu0 %v858_v0, %s813_s21 }
  0x3a   :  { %290 = vrot.lane.b32.xlu1 %v864_v2, %s813_s21  ;;  %288 = vrot.lane.b32.xlu0 %v860_v1, %s813_s21 }
  0x3e   :  { %247 = vrot.lane.b32.xlu1 %v870_v3, %s814_s22  ;;  %245 = vrot.lane.b32.xlu0 %v858_v0, %s814_s22 }
  0x42   :  { %251 = vrot.lane.b32.xlu1 %v864_v2, %s814_s22  ;;  %249 = vrot.lane.b32.xlu0 %v860_v1, %s814_s22 }
  0x46   :  { %260 = vrot.lane.b32.xlu1 %v870_v3, %s815_s23  ;;  %258 = vrot.lane.b32.xlu0 %v858_v0, %s815_s23 }
  0x4a   :  { %264 = vrot.lane.b32.xlu1 %v864_v2, %s815_s23  ;;  %262 = vrot.lane.b32.xlu0 %v860_v1, %s815_s23 }
  0x4e   :  { %221 = vrot.lane.b32.xlu1 %v870_v3, %s816_s24  ;;  %219 = vrot.lane.b32.xlu0 %v858_v0, %s816_s24 }
  0x52   :  { %225 = vrot.lane.b32.xlu1 %v864_v2, %s816_s24  ;;  %223 = vrot.lane.b32.xlu0 %v860_v1, %s816_s24 }
  0x56   :  { %234 = vrot.lane.b32.xlu1 %v870_v3, %s817_s25  ;;  %232 = vrot.lane.b32.xlu0 %v858_v0, %s817_s25 }
  0x5a   :  { %238 = vrot.lane.b32.xlu1 %v864_v2, %s817_s25  ;;  %236 = vrot.lane.b32.xlu0 %v860_v1, %s817_s25 }
  0x5e   :  { %195 = vrot.lane.b32.xlu1 %v870_v3, %s818_s26  ;;  %193 = vrot.lane.b32.xlu0 %v858_v0, %s818_s26 }
  0x62   :  { %199 = vrot.lane.b32.xlu1 %v864_v2, %s818_s26  ;;  %197 = vrot.lane.b32.xlu0 %v860_v1, %s818_s26 }
  0x66   :  { %208 = vrot.lane.b32.xlu1 %v870_v3, %s819_s27  ;;  %206 = vrot.lane.b32.xlu0 %v858_v0, %s819_s27 }
  0x6a   :  { %212 = vrot.lane.b32.xlu1 %v864_v2, %s819_s27  ;;  %210 = vrot.lane.b32.xlu0 %v860_v1, %s819_s27 }
  0x6e   :  { %169 = vrot.lane.b32.xlu1 %v870_v3, %s820_s28  ;;  %167 = vrot.lane.b32.xlu0 %v858_v0, %s820_s28 }
  0x72   :  { %173 = vrot.lane.b32.xlu1 %v864_v2, %s820_s28  ;;  %171 = vrot.lane.b32.xlu0 %v860_v1, %s820_s28 }
  0x76   :  { %182 = vrot.lane.b32.xlu1 %v870_v3, %s821_s29  ;;  %180 = vrot.lane.b32.xlu0 %v858_v0, %s821_s29 }
  0x7a   :  { %186 = vrot.lane.b32.xlu1 %v864_v2, %s821_s29  ;;  %184 = vrot.lane.b32.xlu0 %v860_v1, %s821_s29 }
  0x7e   :  { %143 = vrot.lane.b32.xlu1 %v870_v3, %s822_s30  ;;  %141 = vrot.lane.b32.xlu0 %v858_v0, %s822_s30 }
  0x80   :  { %v328_v4 = vpop.permute.xlu1 %327  ;;  %v324_v5 = vpop.permute.xlu0 %323 }
  0x82   :  { %147 = vrot.lane.b32.xlu1 %v864_v2, %s822_s30  ;;  %145 = vrot.lane.b32.xlu0 %v860_v1, %s822_s30 }
  0x84   :  { %v330_v6 = vpop.permute.xlu1 %329  ;;  %v337_v7 = vpop.permute.xlu0 %336 }
  0x85   :  { %v332_v24 = vsel %vm331_vm2, %v328_v4, %v330_v6  ;;  %v335_v25 = vsel %vm331_vm2, %v330_v6, %v324_v5 }
  0x86   :  { %156 = vrot.lane.b32.xlu1 %v870_v3, %s823_s4  ;;  %154 = vrot.lane.b32.xlu0 %v858_v0, %s823_s4  ;;  %v520_v28 = vrot.slane %v332_v24, 4  ;;  %v521_v29 = vrot.slane %v335_v25, 4 }
  0x88   :  { %v339_v9 = vpop.permute.xlu1 %338  ;;  %v326_v10 = vpop.permute.xlu0 %325 }
  0x89   :  { %v347_v17 = vsel %vm344_vm1, %v337_v7, %v339_v9  ;;  %v333_v26 = vsel %vm331_vm2, %v326_v10, %v328_v4  ;;  %v334_v27 = vsel %vm331_vm2, %v324_v5, %v326_v10  ;;  %vm136_vm2 = vcmp.lt.s32.totalorder %v932_v11, 109 }
  0x8a   :  { %160 = vrot.lane.b32.xlu1 %v864_v2, %s823_s4  ;;  %158 = vrot.lane.b32.xlu0 %v860_v1, %s823_s4  ;;  %v519_v30 = vrot.slane %v333_v26, 4  ;;  %v518_v34 = vrot.slane %v334_v27, 4 }
  0x8c   :  { %v343_v12 = vpop.permute.xlu1 %342  ;;  %v341_v13 = vpop.permute.xlu0 %340 }
  0x8d   :  { %v348_v14 = vsel %vm344_vm1, %v343_v12, %v337_v7  ;;  %v346_v15 = vsel %vm344_vm1, %v339_v9, %v341_v13  ;;  %v345_v16 = vsel %vm344_vm1, %v341_v13, %v343_v12  ;;  %vm149_vm1 = vcmp.lt.s32.totalorder %v932_v11, 108 }
  0x8e   :  { %117 = vrot.lane.b32.xlu1 %v870_v3, %s824_s5  ;;  %729 = vmatprep.subr.msk.mxu1 %vm445_vm0, %v348_v14 }
  0x8f   :  { %115 = vrot.lane.b32.xlu0 %v858_v0, %s824_s5  ;;  %726 = vmatprep.subr.msk.mxu0 %vm445_vm0, %v346_v15 }
  0x90   :  { %727 = vmatpush1.msk.msra.mxu0 %vm445_vm0, %v347_v17  ;;  %730 = vmatpush1.msk.msra.mxu1 %vm445_vm0, %v345_v16  ;;  %v300_v18 = vpop.permute.xlu1 %299  ;;  %v298_v19 = vpop.permute.xlu0 %297 }
  0x91   :  { %v308_v51 = vsel %vm305_vm4, %v298_v19, %v300_v18 }
  0x92   :  { %121 = vrot.lane.b32.xlu1 %v864_v2, %s824_s5  ;;  %v506_v58 = vrot.slane %v308_v51, 4 }
  0x93   :  { %119 = vrot.lane.b32.xlu0 %v860_v1, %s824_s5 }
  0x94   :  { %v304_v20 = vpop.permute.xlu1 %303  ;;  %v302_v21 = vpop.permute.xlu0 %301 }
  0x95   :  { %v309_v48 = vsel %vm305_vm4, %v304_v20, %v298_v19  ;;  %v306_v49 = vsel %vm305_vm4, %v302_v21, %v304_v20  ;;  %v307_v50 = vsel %vm305_vm4, %v300_v18, %v302_v21  ;;  %vm110_vm4 = vcmp.lt.s32.totalorder %v932_v11, 111 }
  0x96   :  { %130 = vrot.lane.b32.xlu1 %v870_v3, %s825_s6  ;;  %v509_v52 = vrot.slane %v309_v48, 4  ;;  %v507_v53 = vrot.slane %v307_v50, 4  ;;  %v508_v54 = vrot.slane %v306_v49, 4 }
  0x97   :  { %128 = vrot.lane.b32.xlu0 %v858_v0, %s825_s6 }
  0x98   :  { %v313_v22 = vpop.permute.xlu1 %312  ;;  %v311_v23 = vpop.permute.xlu0 %310 }
  0x99   :  { %v321_v31 = vsel %vm318_vm3, %v311_v23, %v313_v22 }
  0x9a   :  { %134 = vrot.lane.b32.xlu1 %v864_v2, %s825_s6  ;;  %v538_v41 = vsel %vm445_vm0, %v321_v31, %v518_v34 }
  0x9b   :  { %132 = vrot.lane.b32.xlu0 %v860_v1, %s825_s6 }
  0x9c   :  { %v317_v32 = vpop.permute.xlu1 %316  ;;  %v315_v33 = vpop.permute.xlu0 %314 }
  0x9d   :  { %v322_v35 = vsel %vm318_vm3, %v317_v32, %v311_v23  ;;  %v319_v36 = vsel %vm318_vm3, %v315_v33, %v317_v32  ;;  %v320_v37 = vsel %vm318_vm3, %v313_v22, %v315_v33  ;;  %v831_v33 = vmov 0.0  }
  0x9e   :  { %91 = vrot.lane.b32.xlu1 %v870_v3, %s826_s7  ;;  %v539_v38 = vsel %vm445_vm0, %v320_v37, %v519_v30  ;;  %v541_v39 = vsel %vm445_vm0, %v322_v35, %v521_v29  ;;  %v540_v40 = vsel %vm445_vm0, %v319_v36, %v520_v28  ;;  %629 = vmatprep.mubr.f32.mxu0 %v831_v33  ;;  %v832_v36 = vmov 0  }
  0x9f   :  { %89 = vrot.lane.b32.xlu0 %v858_v0, %s826_s7  ;;  %573 = vmatprep.subr.mxu0 %v539_v38  ;;  %vm123_vm3 = vcmp.lt.s32.totalorder %v932_v11, 110 }
  0xa0   :  { %644 = vmatprep.subr.mxu1 %v541_v39  ;;  %v274_v42 = vpop.permute.xlu1 %273  ;;  %574 = vmatpush1.msra.mxu0 %v538_v41  ;;  %v272_v43 = vpop.permute.xlu0 %271 }
  0xa1   :  { %645 = vmatpush1.msra.mxu1 %v540_v40  ;;  %v282_v16 = vsel %vm279_vm6, %v272_v43, %v274_v42  ;;  %700 = vmatprep.mubr.f32.mxu1 %v831_v33 }
  0xa2   :  { %95 = vrot.lane.b32.xlu1 %v864_v2, %s826_s7  ;;  %v494_v23 = vrot.slane %v282_v16, 4  ;;  %760 = vset.pattern.permute.xlu0 %v832_v36 }
  0xa3   :  { %93 = vrot.lane.b32.xlu0 %v860_v1, %s826_s7 }
  0xa4   :  { %v278_v44 = vpop.permute.xlu1 %277  ;;  %v276_v45 = vpop.permute.xlu0 %275 }
  0xa5   :  { %v283_v13 = vsel %vm279_vm6, %v278_v44, %v272_v43  ;;  %v280_v14 = vsel %vm279_vm6, %v276_v45, %v278_v44  ;;  %v281_v15 = vsel %vm279_vm6, %v274_v42, %v276_v45  ;;  %vm84_vm6 = vcmp.lt.s32.totalorder %v932_v11, 124 }
  0xa6   :  { %104 = vrot.lane.b32.xlu1 %v870_v3, %s827_s8  ;;  %v497_v17 = vrot.slane %v283_v13, 4  ;;  %v495_v18 = vrot.slane %v281_v15, 4  ;;  %v496_v19 = vrot.slane %v280_v14, 4 }
  0xa7   :  { %102 = vrot.lane.b32.xlu0 %v858_v0, %s827_s8 }
  0xa8   :  { %v287_v46 = vpop.permute.xlu1 %286  ;;  %v285_v47 = vpop.permute.xlu0 %284 }
  0xa9   :  { %v295_v55 = vsel %vm292_vm5, %v285_v47, %v287_v46 }
  0xaa   :  { %108 = vrot.lane.b32.xlu1 %v864_v2, %s827_s8  ;;  %v534_v5 = vsel %vm445_vm0, %v295_v55, %v506_v58 }
  0xab   :  { %106 = vrot.lane.b32.xlu0 %v860_v1, %s827_s8 }
  0xac   :  { %v291_v56 = vpop.permute.xlu1 %290  ;;  %v289_v57 = vpop.permute.xlu0 %288 }
  0xad   :  { %v296_v59 = vsel %vm292_vm5, %v291_v56, %v285_v47  ;;  %v293_v60 = vsel %vm292_vm5, %v289_v57, %v291_v56  ;;  %v294_v61 = vsel %vm292_vm5, %v287_v46, %v289_v57  ;;  %v543_v56 = vld [vmem:[%s1063_s2] sm:$0xff]  ;;  %vm97_vm5 = vcmp.lt.s32.totalorder %v932_v11, 112 }
  0xae   :  { %65 = vrot.lane.b32.xlu1 %v870_v3, %s828_s9  ;;  %v535_v62 = vsel %vm445_vm0, %v294_v61, %v507_v53  ;;  %v537_v63 = vsel %vm445_vm0, %v296_v59, %v509_v52  ;;  %v536_v4 = vsel %vm445_vm0, %v293_v60, %v508_v54 }
  0xaf   :  { %63 = vrot.lane.b32.xlu0 %v858_v0, %s828_s9  ;;  %575 = vmatprep.subr.mxu0 %v535_v62 }
  0xb0   :  { %646 = vmatprep.subr.mxu1 %v537_v63  ;;  %v971_v6 = vpop.permute.xlu1 %247  ;;  %576 = vmatpush1.msra.mxu0 %v534_v5  ;;  %v246_v7 = vpop.permute.xlu0 %245 }
  0xb1   :  { %647 = vmatpush1.msra.mxu1 %v536_v4  ;;  %v256_v42 = vsel %vm253_vm8, %v246_v7, %v971_v6 }
  0xb2   :  { %69 = vrot.lane.b32.xlu1 %v864_v2, %s828_s9  ;;  %v482_v49 = vrot.slane %v256_v42, 4 }
  0xb3   :  { %67 = vrot.lane.b32.xlu0 %v860_v1, %s828_s9 }
  0xb4   :  { %v252_v8 = vpop.permute.xlu1 %251  ;;  %v250_v9 = vpop.permute.xlu0 %249 }
  0xb5   :  { %v257_v39 = vsel %vm253_vm8, %v252_v8, %v246_v7  ;;  %v254_v40 = vsel %vm253_vm8, %v250_v9, %v252_v8  ;;  %v255_v41 = vsel %vm253_vm8, %v971_v6, %v250_v9  ;;  %vm45_vm8 = vcmp.lt.s32.totalorder %v932_v11, 127 }
  0xb6   :  { %78 = vrot.lane.b32.xlu1 %v870_v3, %s829_s10  ;;  %v485_v43 = vrot.slane %v257_v39, 4  ;;  %v483_v44 = vrot.slane %v255_v41, 4  ;;  %v484_v45 = vrot.slane %v254_v40, 4 }
  0xb7   :  { %76 = vrot.lane.b32.xlu0 %v858_v0, %s829_s10 }
  0xb8   :  { %v261_v10 = vpop.permute.xlu1 %260  ;;  %v259_v12 = vpop.permute.xlu0 %258 }
  0xb9   :  { %v269_v20 = vsel %vm266_vm7, %v259_v12, %v261_v10 }
  0xba   :  { %82 = vrot.lane.b32.xlu1 %v864_v2, %s829_s10  ;;  %v530_v30 = vsel %vm445_vm0, %v269_v20, %v494_v23 }
  0xbb   :  { %80 = vrot.lane.b32.xlu0 %v860_v1, %s829_s10 }
  0xbc   :  { %v265_v21 = vpop.permute.xlu1 %264  ;;  %v263_v22 = vpop.permute.xlu0 %262 }
  0xbd   :  { %v270_v24 = vsel %vm266_vm7, %v265_v21, %v259_v12  ;;  %v267_v25 = vsel %vm266_vm7, %v263_v22, %v265_v21  ;;  %v268_v26 = vsel %vm266_vm7, %v261_v10, %v263_v22  ;;  %vm71_vm7 = vcmp.lt.s32.totalorder %v932_v11, 125 }
  0xbe   :  { %37 = vrot.lane.b32.xlu1 %v870_v3, %s830_s11  ;;  %v531_v27 = vsel %vm445_vm0, %v268_v26, %v495_v18  ;;  %v533_v28 = vsel %vm445_vm0, %v270_v24, %v497_v17  ;;  %v532_v29 = vsel %vm445_vm0, %v267_v25, %v496_v19 }
  0xbf   :  { %35 = vrot.lane.b32.xlu0 %v858_v0, %s830_s11  ;;  %577 = vmatprep.subr.mxu0 %v531_v27 }
  0xc0   :  { %648 = vmatprep.subr.mxu1 %v533_v28  ;;  %v222_v31 = vpop.permute.xlu1 %221  ;;  %578 = vmatpush1.msra.mxu0 %v530_v30  ;;  %v220_v32 = vpop.permute.xlu0 %219 }
  0xc1   :  { %649 = vmatpush1.msra.mxu1 %v532_v29  ;;  %v230_v7 = vsel %vm227_vm10, %v220_v32, %v222_v31 }
  0xc2   :  { %41 = vrot.lane.b32.xlu1 %v864_v2, %s830_s11  ;;  %v437_v15 = vrot.slane %v230_v7, 4 }
  0xc3   :  { %39 = vrot.lane.b32.xlu0 %v860_v1, %s830_s11 }
  0xc4   :  { %v226_v34 = vpop.permute.xlu1 %225  ;;  %v224_v35 = vpop.permute.xlu0 %223 }
  0xc5   :  { %v231_v4 = vsel %vm227_vm10, %v226_v34, %v220_v32  ;;  %v228_v5 = vsel %vm227_vm10, %v224_v35, %v226_v34  ;;  %v229_v6 = vsel %vm227_vm10, %v222_v31, %v224_v35  ;;  %vm549_vm10 = vcmask 818176  }
  0xc6   :  { %52 = vrot.lane.b32.xlu1 %v870_v3, %s833_s12  ;;  %v440_v8 = vrot.slane %v231_v4, 4  ;;  %v438_v9 = vrot.slane %v229_v6, 4  ;;  %v439_v10 = vrot.slane %v228_v5, 4 }
  0xc7   :  { %50 = vrot.lane.b32.xlu0 %v858_v0, %s833_s12 }
  0xc8   :  { %v235_v37 = vpop.permute.xlu1 %234  ;;  %v233_v38 = vpop.permute.xlu0 %232 }
  0xc9   :  { %v243_v46 = vsel %vm240_vm9, %v233_v38, %v235_v37 }
  0xca   :  { %56 = vrot.lane.b32.xlu1 %v864_v2, %s833_s12  ;;  %v526_v57 = vsel %vm445_vm0, %v243_v46, %v482_v49 }
  0xcb   :  { %54 = vrot.lane.b32.xlu0 %v860_v1, %s833_s12 }
  0xcc   :  { %v239_v47 = vpop.permute.xlu1 %238  ;;  %v237_v48 = vpop.permute.xlu0 %236 }
  0xcd   :  { %v244_v50 = vsel %vm240_vm9, %v239_v47, %v233_v38  ;;  %v241_v51 = vsel %vm240_vm9, %v237_v48, %v239_v47  ;;  %v242_v52 = vsel %vm240_vm9, %v235_v37, %v237_v48  ;;  %vm58_vm9 = vcmp.lt.s32.totalorder %v932_v11, 126 }
  0xce   :  { %v527_v53 = vsel %vm445_vm0, %v242_v52, %v483_v44  ;;  %v529_v54 = vsel %vm445_vm0, %v244_v50, %v485_v43  ;;  %v528_v55 = vsel %vm445_vm0, %v241_v51, %v484_v45 }
  0xcf   :  { %579 = vmatprep.subr.mxu0 %v527_v53  ;;  %650 = vmatprep.subr.mxu1 %v529_v54 }
  0xd0   :  { %v196_v58 = vpop.permute.xlu1 %195  ;;  %580 = vmatpush1.msra.mxu0 %v526_v57  ;;  %651 = vmatpush1.msra.mxu1 %v528_v55  ;;  %v194_v59 = vpop.permute.xlu0 %193 }
  0xd1   :  { %546 = vperm.xlu0 %760, %v543_v56   ;;  %v204_v32 = vsel %vm201_vm12, %v194_v59, %v196_v58 }
  0xd2   :  { %v425_v39 = vrot.slane %v204_v32, 4 }
  0xd4   :  { %v200_v60 = vpop.permute.xlu1 %199  ;;  %v198_v61 = vpop.permute.xlu0 %197 }
  0xd5   :  { %v205_v29 = vsel %vm201_vm12, %v200_v60, %v194_v59  ;;  %v202_v30 = vsel %vm201_vm12, %v198_v61, %v200_v60  ;;  %v203_v31 = vsel %vm201_vm12, %v196_v58, %v198_v61 }
  0xd6   :  { %v428_v33 = vrot.slane %v205_v29, 4  ;;  %v426_v34 = vrot.slane %v203_v31, 4  ;;  %v427_v35 = vrot.slane %v202_v30, 4 }
  0xd8   :  { %v209_v62 = vpop.permute.xlu1 %208  ;;  %v207_v63 = vpop.permute.xlu0 %206 }
  0xd9   :  { %v217_v12 = vsel %vm214_vm11, %v207_v63, %v209_v62 }
  0xda   :  { %v474_v22 = vsel %vm445_vm0, %v217_v12, %v437_v15 }
  0xdc   :  { %v213_v13 = vpop.permute.xlu1 %212  ;;  %v211_v14 = vpop.permute.xlu0 %210 }
  0xdd   :  { %v218_v16 = vsel %vm214_vm11, %v213_v13, %v207_v63  ;;  %v215_v17 = vsel %vm214_vm11, %v211_v14, %v213_v13  ;;  %v216_v18 = vsel %vm214_vm11, %v209_v62, %v211_v14 }
  0xde   :  { %v475_v19 = vsel %vm445_vm0, %v216_v18, %v438_v9  ;;  %v477_v20 = vsel %vm445_vm0, %v218_v16, %v440_v8  ;;  %v476_v21 = vsel %vm445_vm0, %v215_v17, %v439_v10 }
  0xdf   :  { %581 = vmatprep.subr.mxu0 %v475_v19  ;;  %652 = vmatprep.subr.mxu1 %v477_v20 }
  0xe0   :  { %v170_v23 = vpop.permute.xlu1 %169  ;;  %582 = vmatpush1.msra.mxu0 %v474_v22  ;;  %653 = vmatpush1.msra.mxu1 %v476_v21  ;;  %v168_v24 = vpop.permute.xlu0 %167 }
  0xe1   :  { %v178_v56 = vsel %vm175_vm14, %v168_v24, %v170_v23 }
  0xe2   :  { %v413_v63 = vrot.slane %v178_v56, 4 }
  0xe4   :  { %v174_v25 = vpop.permute.xlu1 %173  ;;  %v172_v26 = vpop.permute.xlu0 %171 }
  0xe5   :  { %v179_v53 = vsel %vm175_vm14, %v174_v25, %v168_v24  ;;  %v176_v54 = vsel %vm175_vm14, %v172_v26, %v174_v25  ;;  %v177_v55 = vsel %vm175_vm14, %v170_v23, %v172_v26 }
  0xe6   :  { %v416_v57 = vrot.slane %v179_v53, 4  ;;  %v414_v58 = vrot.slane %v177_v55, 4  ;;  %v415_v59 = vrot.slane %v176_v54, 4 }
  0xe8   :  { %v183_v27 = vpop.permute.xlu1 %182  ;;  %v181_v28 = vpop.permute.xlu0 %180 }
  0xe9   :  { %v191_v36 = vsel %vm188_vm13, %v181_v28, %v183_v27 }
  0xea   :  { %v470_v46 = vsel %vm445_vm0, %v191_v36, %v425_v39 }
  0xec   :  { %v187_v37 = vpop.permute.xlu1 %186  ;;  %v185_v38 = vpop.permute.xlu0 %184 }
  0xed   :  { %v192_v40 = vsel %vm188_vm13, %v187_v37, %v181_v28  ;;  %v189_v41 = vsel %vm188_vm13, %v185_v38, %v187_v37  ;;  %v190_v42 = vsel %vm188_vm13, %v183_v27, %v185_v38 }
  0xee   :  { %v471_v43 = vsel %vm445_vm0, %v190_v42, %v426_v34  ;;  %v473_v44 = vsel %vm445_vm0, %v192_v40, %v428_v33  ;;  %v472_v45 = vsel %vm445_vm0, %v189_v41, %v427_v35 }
  0xef   :  { %583 = vmatprep.subr.mxu0 %v471_v43  ;;  %654 = vmatprep.subr.mxu1 %v473_v44 }
  0xf0   :  { %v144_v47 = vpop.permute.xlu1 %143  ;;  %584 = vmatpush1.msra.mxu0 %v470_v46  ;;  %655 = vmatpush1.msra.mxu1 %v472_v45  ;;  %v142_v48 = vpop.permute.xlu0 %141 }
  0xf1   :  { %v152_v21 = vsel %vm149_vm1, %v142_v48, %v144_v47 }
  0xf2   :  { %v401_v29 = vrot.slane %v152_v21, 4 }
  0xf4   :  { %v148_v49 = vpop.permute.xlu1 %147  ;;  %v146_v50 = vpop.permute.xlu0 %145 }
  0xf5   :  { %v153_v17 = vsel %vm149_vm1, %v148_v49, %v142_v48  ;;  %v150_v19 = vsel %vm149_vm1, %v146_v50, %v148_v49  ;;  %v151_v20 = vsel %vm149_vm1, %v144_v47, %v146_v50 }
  0xf6   :  { %v404_v22 = vrot.slane %v153_v17, 4  ;;  %v402_v24 = vrot.slane %v151_v20, 4  ;;  %v403_v25 = vrot.slane %v150_v19, 4 }
  0xf8   :  { %v157_v51 = vpop.permute.xlu1 %156  ;;  %v155_v52 = vpop.permute.xlu0 %154 }
  0xf9   :  { %v165_v60 = vsel %vm162_vm15, %v155_v52, %v157_v51 }
  0xfa   :  { %v466_v10 = vsel %vm445_vm0, %v165_v60, %v413_v63 }
  0xfc   :  { %v161_v61 = vpop.permute.xlu1 %160  ;;  %v159_v62 = vpop.permute.xlu0 %158 }
  0xfd   :  { %v166_v4 = vsel %vm162_vm15, %v161_v61, %v155_v52  ;;  %v163_v5 = vsel %vm162_vm15, %v159_v62, %v161_v61  ;;  %v164_v6 = vsel %vm162_vm15, %v157_v51, %v159_v62 }
  0xfe   :  { %v467_v7 = vsel %vm445_vm0, %v164_v6, %v414_v58  ;;  %v469_v8 = vsel %vm445_vm0, %v166_v4, %v416_v57  ;;  %v468_v9 = vsel %vm445_vm0, %v163_v5, %v415_v59 }
  0xff   :  { %585 = vmatprep.subr.mxu0 %v467_v7  ;;  %656 = vmatprep.subr.mxu1 %v469_v8 }
 0x100   :  { %v118_v12 = vpop.permute.xlu1 %117  ;;  %586 = vmatpush1.msra.mxu0 %v466_v10  ;;  %657 = vmatpush1.msra.mxu1 %v468_v9 }
 0x101   :  { %v116_v13 = vpop.permute.xlu0 %115 }
 0x102   :  { %v126_v45 = vsel %vm123_vm3, %v116_v13, %v118_v12 }
 0x103   :  { %v389_v53 = vrot.slane %v126_v45, 4 }
 0x104   :  { %v122_v14 = vpop.permute.xlu1 %121 }
 0x105   :  { %v120_v15 = vpop.permute.xlu0 %119  ;;  %v127_v41 = vsel %vm123_vm3, %v122_v14, %v116_v13 }
 0x106   :  { %v124_v43 = vsel %vm123_vm3, %v120_v15, %v122_v14  ;;  %v125_v44 = vsel %vm123_vm3, %v118_v12, %v120_v15  ;;  %v392_v46 = vrot.slane %v127_v41, 4 }
 0x107   :  { %v390_v48 = vrot.slane %v125_v44, 4  ;;  %v391_v49 = vrot.slane %v124_v43, 4 }
 0x108   :  { %v131_v16 = vpop.permute.xlu1 %130 }
 0x109   :  { %v129_v18 = vpop.permute.xlu0 %128 }
 0x10a   :  { %v139_v26 = vsel %vm136_vm2, %v129_v18, %v131_v16 }
 0x10b   :  { %v462_v36 = vsel %vm445_vm0, %v139_v26, %v401_v29 }
 0x10c   :  { %v135_v23 = vpop.permute.xlu1 %134 }
 0x10d   :  { %v140_v27 = vsel %vm136_vm2, %v135_v23, %v129_v18  ;;  %v133_v28 = vpop.permute.xlu0 %132 }
 0x10e   :  { %v137_v30 = vsel %vm136_vm2, %v133_v28, %v135_v23  ;;  %v138_v31 = vsel %vm136_vm2, %v131_v16, %v133_v28  ;;  %v465_v32 = vsel %vm445_vm0, %v140_v27, %v404_v22 }
 0x10f   :  { %v463_v33 = vsel %vm445_vm0, %v138_v31, %v402_v24  ;;  %658 = vmatprep.subr.mxu1 %v465_v32  ;;  %v464_v34 = vsel %vm445_vm0, %v137_v30, %v403_v25 }
 0x110   :  { %587 = vmatprep.subr.mxu0 %v463_v33  ;;  %v92_v35 = vpop.permute.xlu1 %91  ;;  %659 = vmatpush1.msra.mxu1 %v464_v34 }
 0x111   :  { %588 = vmatpush1.msra.mxu0 %v462_v36  ;;  %v90_v37 = vpop.permute.xlu0 %89 }
 0x112   :  { %v100_v9 = vsel %vm97_vm5, %v90_v37, %v92_v35 }
 0x113   :  { %v377_v18 = vrot.slane %v100_v9, 4 }
 0x114   :  { %v96_v38 = vpop.permute.xlu1 %95 }
 0x115   :  { %v94_v39 = vpop.permute.xlu0 %93  ;;  %v101_v5 = vsel %vm97_vm5, %v96_v38, %v90_v37 }
 0x116   :  { %v98_v7 = vsel %vm97_vm5, %v94_v39, %v96_v38  ;;  %v99_v8 = vsel %vm97_vm5, %v92_v35, %v94_v39  ;;  %v380_v10 = vrot.slane %v101_v5, 4 }
 0x117   :  { %v378_v13 = vrot.slane %v99_v8, 4  ;;  %v379_v14 = vrot.slane %v98_v7, 4 }
 0x118   :  { %v105_v40 = vpop.permute.xlu1 %104 }
 0x119   :  { %v103_v42 = vpop.permute.xlu0 %102 }
 0x11a   :  { %v113_v50 = vsel %vm110_vm4, %v103_v42, %v105_v40 }
 0x11b   :  { %v458_v60 = vsel %vm445_vm0, %v113_v50, %v389_v53 }
 0x11c   :  { %v109_v47 = vpop.permute.xlu1 %108 }
 0x11d   :  { %v114_v51 = vsel %vm110_vm4, %v109_v47, %v103_v42  ;;  %v107_v52 = vpop.permute.xlu0 %106 }
 0x11e   :  { %v111_v54 = vsel %vm110_vm4, %v107_v52, %v109_v47  ;;  %v112_v55 = vsel %vm110_vm4, %v105_v40, %v107_v52  ;;  %v461_v56 = vsel %vm445_vm0, %v114_v51, %v392_v46 }
 0x11f   :  { %v459_v57 = vsel %vm445_vm0, %v112_v55, %v390_v48  ;;  %660 = vmatprep.subr.mxu1 %v461_v56  ;;  %v460_v58 = vsel %vm445_vm0, %v111_v54, %v391_v49 }
 0x120   :  { %589 = vmatprep.subr.mxu0 %v459_v57  ;;  %v66_v59 = vpop.permute.xlu1 %65  ;;  %661 = vmatpush1.msra.mxu1 %v460_v58  ;;  %v542_v57 = vld [vmem:[%s1062_s1] sm:$0xff]  ;;  %s834_s1 = smov [#allocation5]  }
 0x121   :  { %590 = vmatpush1.msra.mxu0 %v458_v60  ;;  %v64_v61 = vpop.permute.xlu0 %63  ;;  %s717_s16 = sshll.u32 %s834_s1, 4  ;;  %s718_s16 = int_to_ptr.vmem [resolvable:$true] %s717_s16 }
 0x122   :  { %v74_v29 = vsel %vm71_vm7, %v64_v61, %v66_v59  ;;  %s783_s17 = scalar_lea.vmem %s718_s16, 512  ;;  %p788_p6 = scmp.lt.s32.totalorder %s718_s16, %s718_s16 }
 0x123   :  { %v365_v38 = vrot.slane %v74_v29, 4  ;;  %p784_p5 = scmp.ne.s32.totalorder %s718_s16, %s783_s17  ;;  %p789_p7 = scmp.lt.s32.totalorder %s783_s17, %s783_s17 }
 0x124   :  { %v70_v62 = vpop.permute.xlu1 %69 }
 0x125   :  { %v68_v63 = vpop.permute.xlu0 %67  ;;  %v75_v31 = vsel %vm71_vm7, %v70_v62, %v64_v61  ;;  %p790_p8 = por %p789_p7, %p788_p6 }
 0x126   :  { %v72_v32 = vsel %vm71_vm7, %v68_v63, %v70_v62  ;;  %v73_v33 = vsel %vm71_vm7, %v66_v59, %v68_v63  ;;  %v368_v40 = vrot.slane %v75_v31, 4 }
 0x127   :  { %v366_v41 = vrot.slane %v73_v33, 4  ;;  %v367_v42 = vrot.slane %v72_v32, 4  ;;  %p791_p9 = pnand %p790_p8, %p784_p5 }
 0x128   :  { %v79_v4 = vpop.permute.xlu1 %78 }
 0x129   :  { %v77_v6 = vpop.permute.xlu0 %76 }
 0x12a   :  { %v87_v15 = vsel %vm84_vm6, %v77_v6, %v79_v4 }
 0x12b   :  { %v454_v25 = vsel %vm445_vm0, %v87_v15, %v377_v18 }
 0x12c   :  { %v83_v12 = vpop.permute.xlu1 %82 }
 0x12d   :  { %v88_v16 = vsel %vm84_vm6, %v83_v12, %v77_v6  ;;  %v81_v17 = vpop.permute.xlu0 %80 }
 0x12e   :  { %v85_v19 = vsel %vm84_vm6, %v81_v17, %v83_v12  ;;  %v86_v20 = vsel %vm84_vm6, %v79_v4, %v81_v17  ;;  %v457_v21 = vsel %vm445_vm0, %v88_v16, %v380_v10 }
 0x12f   :  { %v455_v22 = vsel %vm445_vm0, %v86_v20, %v378_v13  ;;  %662 = vmatprep.subr.mxu1 %v457_v21  ;;  %v456_v23 = vsel %vm445_vm0, %v85_v19, %v379_v14 }
 0x130   :  { %591 = vmatprep.subr.mxu0 %v455_v22  ;;  %v38_v24 = vpop.permute.xlu1 %37  ;;  %663 = vmatpush1.msra.mxu1 %v456_v23 }
 0x131   :  { %592 = vmatpush1.msra.mxu0 %v454_v25  ;;  %v36_v26 = vpop.permute.xlu0 %35 }
 0x132   :  { %v48_v39 = vsel %vm45_vm8, %v36_v26, %v38_v24 }
 0x133   :  { %v353_v50 = vrot.slane %v48_v39, 4 }
 0x134   :  { %v42_v27 = vpop.permute.xlu1 %41 }
 0x135   :  { %v40_v28 = vpop.permute.xlu0 %39  ;;  %v49_v34 = vsel %vm45_vm8, %v42_v27, %v36_v26  ;;  %v446_v60 = vsel %vm445_vm0, %v858_v0, %v353_v50 }
 0x136   :  { %v46_v36 = vsel %vm45_vm8, %v40_v28, %v42_v27  ;;  %v47_v37 = vsel %vm45_vm8, %v38_v24, %v40_v28  ;;  %v356_v43 = vrot.slane %v49_v34, 4 }
 0x137   :  { %v354_v45 = vrot.slane %v47_v37, 4  ;;  %v355_v46 = vrot.slane %v46_v36, 4 }
 0x138   :  { %v53_v30 = vpop.permute.xlu1 %52  ;;  %v449_v56 = vsel %vm445_vm0, %v864_v2, %v356_v43 }
 0x139   :  { %v51_v35 = vpop.permute.xlu0 %50  ;;  %v447_v58 = vsel %vm445_vm0, %v870_v3, %v354_v45  ;;  %v448_v59 = vsel %vm445_vm0, %v860_v1, %v355_v46 }
 0x13a   :  { %v61_v47 = vsel %vm58_vm9, %v51_v35, %v53_v30 }
 0x13b   :  { %v450_v55 = vsel %vm445_vm0, %v61_v47, %v365_v38 }
 0x13c   :  { %v57_v44 = vpop.permute.xlu1 %56 }
 0x13d   :  { %v62_v48 = vsel %vm58_vm9, %v57_v44, %v51_v35  ;;  %v55_v49 = vpop.permute.xlu0 %54 }
 0x13e   :  { %v59_v51 = vsel %vm58_vm9, %v55_v49, %v57_v44  ;;  %v60_v52 = vsel %vm58_vm9, %v53_v30, %v55_v49  ;;  %v453_v53 = vsel %vm445_vm0, %v62_v48, %v368_v40 }
 0x13f   :  { %v451_v54 = vsel %vm445_vm0, %v60_v52, %v366_v41  ;;  %664 = vmatprep.subr.mxu1 %v453_v53  ;;  %v452_v11 = vsel %vm445_vm0, %v59_v51, %v367_v42 }
 0x140   :  { %593 = vmatprep.subr.mxu0 %v451_v54  ;;  %665 = vmatpush1.msra.mxu1 %v452_v11 }
 0x141   :  { %594 = vmatpush1.msra.mxu0 %v450_v55  ;;  %666 = vmatprep.subr.mxu1 %v449_v56 }
 0x142   :  { %595 = vmatprep.subr.mxu0 %v447_v58  ;;  %667 = vmatpush1.msra.mxu1 %v448_v59 }
 0x143   :  { %596 = vmatpush1.msra.mxu0 %v446_v60  ;;  %731 = vmatmul.mubr.msk.f32.vlgmr.msra.gmra.mxu1 %vm549_vm10, %v542_v57 }
 0x144   :  { %728 = vmatmul.mubr.msk.f32.vlgmr.msra.gmra.mxu0 %vm549_vm10, %v542_v57 }
 0x14c   :  { %v547_v2 = vpop.permute.xlu0 %546 }
 0x203   :  { %v702_v61 = vpop.f32.mrf.mxu1 }
 0x204   :  { %v631_v62 = vpop.f32.mrf.mxu0  ;;  %v703_v63 = vadd.f32 %v702_v61, %v547_v2 }
 0x205   :  { %v632_v4 = vadd.f32 %v631_v62, %v547_v2  ;;  %v704_v3 = vpop.f32.mrf.mxu1 }
 0x206   :  { %709 = vst [vmem:[#allocation5 + $0x10] sm:$0xff] %v703_v63  ;;  %v633_v5 = vpop.f32.mrf.mxu0  ;;  %v705_v6 = vadd.f32 %v704_v3, %v547_v2 }
 0x207   :  { %707 = vst [vmem:[#allocation5] sm:$0xff] %v632_v4  ;;  %v634_v1 = vadd.f32 %v633_v5, %v547_v2 }
 0x208   :  { %710 = vst [vmem:[#allocation5 + $0x18] sm:$0xff] %v705_v6 }
 0x209   :  { %708 = vst [vmem:[#allocation5 + $0x8] sm:$0xff] %v634_v1 }
 0x20a   :  { %794 = shalt.err (!%p791_p9)
}
 0x20b   :  { %720 = dma.vmem_to_hbm [thread:$0]  %s718_s16, 512, %s1064_s3, [#allocation4]  }
 0x20c   :  { %805 = dma.done.wait [#allocation4], 512  }
 0x20d   :  { %806 = vsyncadd [#allocation4], 4294966784 }
 0x20e   :  { %724 = vsyncpa [#allocation3], 1 }
 0x20f   :  { %725 = vsyncpa [#allocation4], 1 }

</bundles_post_ra>
